<compile_context>
chip_gen: v7x
topology: tpu7x:2x2x1
jax: 0.10.0
libtpu: 0.0.40
codegen_flags: <defaults>
</compile_context>

<pallas_src>
import functools
import math

import numpy as np

import jax
import jax.numpy as jnp
from jax.experimental import pallas as pl
from jax.experimental.pallas import tpu as pltpu


# Conservative scoped-VMEM budget that holds on v5e (16 MiB default scoped),
# v6e (32 MiB) and v7x (32 MiB scoped of 64 MiB physical) without needing a
# vmem_limit_bytes override.
_VMEM_BUDGET_BYTES = 12 * 1024 * 1024


def _round_up(x, m):
    return ((x + m - 1) // m) * m


def _choose_tile(n, preferred=1024, max_pad_frac=0.15):
    """Pick a multiple-of-128 node tile <= preferred and the padded node dim.

    Prefers large tiles (better HBM roofline) but avoids more than
    max_pad_frac extra zero padding of the node axis, since A traffic scales
    with Np^2.  Returns (tile, padded_node_dim); tile always divides padded.
    """
    np128 = _round_up(n, 128)
    preferred = max(128, min(preferred, np128))
    candidates = [t for t in (1024, 768, 512, 384, 256, 128) if t <= preferred]
    if not candidates:
        candidates = [128]
    for t in candidates:
        padded = _round_up(np128, t)
        if np128 % t == 0 or (padded - np128) <= max_pad_frac * np128:
            return t, padded
    t = candidates[-1]
    return t, _round_up(np128, t)


def _stage1_row_block(rows, f_in_p, f_out_p, itemsize, budget=_VMEM_BUDGET_BYTES):
    """Largest row block dividing `rows` whose double-buffered blocks fit VMEM."""
    best = 128
    for rb in (1024, 512, 256, 128):
        if rows % rb != 0:
            continue
        vmem = (2 * rb * f_in_p * itemsize        # X block (double buffered)
                + 2 * f_in_p * f_out_p * itemsize  # W block
                + 2 * rb * f_out_p * itemsize)     # XW output block
        if vmem <= budget:
            return rb
    return best


# ----------------------------- Stage 1: XW = X @ W --------------------------
def _xw_kernel(x_ref, w_ref, xw_ref):
    # x_ref: (rb, F_in_p) bf16, w_ref: (F_in_p, Fp) bf16, xw_ref: (rb, Fp) bf16
    xw = jnp.dot(x_ref[...], w_ref[...], preferred_element_type=jnp.float32)
    xw_ref[...] = xw.astype(xw_ref.dtype)


# -------------------- Stage 2: out = act(A @ XW), tiled ----------------------
def _xw_tile(xw_ref, k, tk, xw_resident):
    if xw_resident:
        start = pl.multiple_of(k * tk, 128)
        return xw_ref[pl.ds(start, tk), :]
    return xw_ref[...]


def _apply_act(acc, negative_slope):
    if negative_slope == 0.0:
        return jnp.maximum(acc, 0.0)
    return jnp.where(acc > 0.0, acc, negative_slope * acc)


def _spmm_act_kernel_f32out(a_ref, xw_ref, o_ref, *, negative_slope, tk,
                            xw_resident):
    # f32 output: accumulate directly into the revisited output block.
    # a_ref: (tm, tk) bf16, xw_ref: (Np, Fp) or (tk, Fp) bf16, o_ref: (tm, Fp) f32
    k = pl.program_id(2)
    partial = jnp.dot(a_ref[...], _xw_tile(xw_ref, k, tk, xw_resident),
                      preferred_element_type=jnp.float32)

    @pl.when(k == 0)
    def _():
        o_ref[...] = partial

    @pl.when(k > 0)
    def _():
        o_ref[...] += partial

    @pl.when(k == pl.num_programs(2) - 1)
    def _():
        o_ref[...] = _apply_act(o_ref[...], negative_slope)


def _spmm_act_kernel_acc(a_ref, xw_ref, o_ref, acc_ref, *, negative_slope, tk,
                         xw_resident):
    # Narrow output dtype: keep an f32 scratch accumulator, cast at k==last.
    k = pl.program_id(2)

    @pl.when(k == 0)
    def _():
        acc_ref[...] = jnp.zeros_like(acc_ref)

    acc_ref[...] += jnp.dot(a_ref[...], _xw_tile(xw_ref, k, tk, xw_resident),
                            preferred_element_type=jnp.float32)

    @pl.when(k == pl.num_programs(2) - 1)
    def _():
        o_ref[...] = _apply_act(acc_ref[...], negative_slope).astype(o_ref.dtype)


def grcu_cites_forward(
    a_seq,
    x_seq,
    weights,
    *,
    negative_slope=0.0,
    tile_m=1024,
    tile_k=1024,
    stream_dtype=jnp.bfloat16,
):
    """a_seq: (T, N, N), x_seq: (T, N, F_in), weights: (F_in, F_out) -> (T, N, F_out)."""
    T, N, N2 = a_seq.shape
    assert N == N2
    F_in, F_out = weights.shape
    assert x_seq.shape == (T, N, F_in)
    out_dtype = x_seq.dtype
    stream_itemsize = np.dtype(stream_dtype).itemsize
    out_itemsize = np.dtype(out_dtype).itemsize

    # ---- tile choice & padded shapes (zero padding keeps the math exact) ----
    preferred = min(tile_m, tile_k)
    tile, Np = _choose_tile(N, preferred)       # node axis, multiple of `tile`
    tm = tk = tile
    Fp = _round_up(F_out, 128)                  # output features: lane-dense
    F_inp = _round_up(F_in, 128)                # contraction dim: lane-dense

    # Cast to the stream dtype BEFORE padding (pad moves 2 B/elem, not 4).
    a_p = a_seq.astype(stream_dtype)
    x_p = x_seq.astype(stream_dtype)
    if Np != N:
        a_p = jnp.pad(a_p, ((0, 0), (0, Np - N), (0, Np - N)))
        x_p = jnp.pad(x_p, ((0, 0), (0, Np - N), (0, 0)))
    if F_inp != F_in:
        x_p = jnp.pad(x_p, ((0, 0), (0, 0), (0, F_inp - F_in)))

    w_p = weights.astype(stream_dtype)
    if F_inp != F_in or Fp != F_out:
        w_p = jnp.pad(w_p, ((0, F_inp - F_in), (0, Fp - F_out)))

    # ---- Stage 1: XW = X @ W, hoisted out of the A-tile loop ---------------
    rows = T * Np
    rb = _stage1_row_block(rows, F_inp, Fp, stream_itemsize)
    x_flat = x_p.reshape(rows, F_inp)

    xw_flat = pl.pallas_call(
        _xw_kernel,
        out_shape=jax.ShapeDtypeStruct((rows, Fp), stream_dtype),
        grid_spec=pltpu.PrefetchScalarGridSpec(
            num_scalar_prefetch=0,
            grid=(rows // rb,),
            in_specs=[
                pl.BlockSpec((rb, F_inp), lambda r: (r, 0)),
                pl.BlockSpec((F_inp, Fp), lambda r: (0, 0)),
            ],
            out_specs=pl.BlockSpec((rb, Fp), lambda r: (r, 0)),
        ),
        compiler_params=pltpu.CompilerParams(
            dimension_semantics=("parallel",),
        ),
    )(x_flat, w_p)
    xw = xw_flat.reshape(T, Np, Fp)

    # ---- Stage 2: out = act(A @ XW) -----------------------------------------
    # Keep XW[t] VMEM-resident across row tiles when it fits the budget
    # (re-DMA'd only when t changes); otherwise stream (tk, Fp) strips.
    accumulate_in_out = (out_dtype == jnp.float32)
    a_vmem = 2 * tm * tk * stream_itemsize
    out_vmem = 2 * tm * Fp * out_itemsize
    acc_vmem = 0 if accumulate_in_out else tm * Fp * 4
    resident_xw_vmem = 2 * Np * Fp * stream_itemsize
    xw_resident = (a_vmem + out_vmem + acc_vmem + resident_xw_vmem
                   ) <= _VMEM_BUDGET_BYTES

    if xw_resident:
        xw_spec = pl.BlockSpec((pl.Squeezed(), Np, Fp), lambda t, i, k: (t, 0, 0))
    else:
        xw_spec = pl.BlockSpec((pl.Squeezed(), tk, Fp), lambda t, i, k: (t, k, 0))

    in_specs = [
        # A row/col tile, streamed in bf16 (the dominant HBM stream).
        pl.BlockSpec((pl.Squeezed(), tm, tk), lambda t, i, k: (t, i, k)),
        xw_spec,
    ]
    out_spec = pl.BlockSpec((pl.Squeezed(), tm, Fp), lambda t, i, k: (t, i, 0))

    if accumulate_in_out:
        kernel = functools.partial(
            _spmm_act_kernel_f32out,
            negative_slope=negative_slope, tk=tk, xw_resident=xw_resident)
        scratch_shapes = ()
    else:
        kernel = functools.partial(
            _spmm_act_kernel_acc,
            negative_slope=negative_slope, tk=tk, xw_resident=xw_resident)
        scratch_shapes = (pltpu.VMEM((tm, Fp), jnp.float32),)

    out_p = pl.pallas_call(
        kernel,
        out_shape=jax.ShapeDtypeStruct((T, Np, Fp), out_dtype),
        grid_spec=pltpu.PrefetchScalarGridSpec(
            num_scalar_prefetch=0,
            grid=(T, Np // tm, Np // tk),
            in_specs=in_specs,
            out_specs=out_spec,
            scratch_shapes=scratch_shapes,
        ),
        compiler_params=pltpu.CompilerParams(
            # timestep + row-tile axes parallel (megacore sharding on v7x;
            # limited upside there since both TCs share HBM), contraction
            # axis last and arbitrary (accumulator / revisited-output pattern).
            dimension_semantics=("parallel", "parallel", "arbitrary"),
        ),
    )(a_p, xw)

    return out_p[:, :N, :F_out]


def init_gcn_weights(key, in_feats, out_feats, dtype=jnp.float32):
    # reset_param: uniform(-stdv, stdv) with stdv = 1 / sqrt(out_feats)
    stdv = 1.0 / math.sqrt(out_feats)
    return jax.random.uniform(
        key, (in_feats, out_feats), dtype=dtype, minval=-stdv, maxval=stdv
    )


if __name__ == "__main__":
    # Small deterministic shapes consistent with the module's forward; N and
    # F_out deliberately non-multiples of 128 to exercise the padding path.
    T, N, F_in, F_out = 4, 200, 48, 32

    key = jax.random.PRNGKey(0)
    k_w, k_a, k_x = jax.random.split(key, 3)

    weights = init_gcn_weights(k_w, F_in, F_out)

    # Synthetic normalized-adjacency-like matrices and node embeddings.
    a_seq = jax.random.uniform(k_a, (T, N, N), dtype=jnp.float32) / N
    x_seq = jax.random.normal(k_x, (T, N, F_in), dtype=jnp.float32)

    out = grcu_cites_forward(a_seq, x_seq, weights)
    out = jax.block_until_ready(out)

    # Pure-JAX f32 reference; tolerance accounts for bf16 streaming of A / X / XW.
    ref = jnp.maximum(jnp.einsum("tnm,tmf->tnf", a_seq, x_seq @ weights), 0.0)
    assert out.shape == (T, N, F_out)
    assert jnp.allclose(out, ref, atol=2e-2, rtol=2e-2), (
        float(jnp.max(jnp.abs(out - ref)))
    )

    print("KERNEL_OK")
</pallas_src>

<mosaic_0001>
module attributes {stable_mosaic.version = 11 : i64} {
  func.func @_xw_kernel(%arg0: i32, %arg1: memref<1024x128xbf16, #tpu.memory_space<vmem>>, %arg2: memref<128x128xbf16, #tpu.memory_space<vmem>>, %arg3: memref<1024x128xbf16, #tpu.memory_space<vmem>>) attributes {dimension_semantics = [#tpu.dimension_semantics<parallel>], iteration_bounds = array<i64: 1>, scalar_prefetch = 0 : i64, scratch_operands = 0 : i64, tpu.core_type = #tpu.core_type<tc>, window_params = [{transform_indices = @transform_0, window_bounds = array<i64: 1024, 128>}, {pipeline_mode = #tpu.pipeline_mode<synchronous>, transform_indices = @transform_1, window_bounds = array<i64: 128, 128>}, {transform_indices = @transform_2, window_bounds = array<i64: 1024, 128>}]} {
    %c0 = arith.constant 0 : index
    %c0_0 = arith.constant 0 : index
    %0 = vector.load %arg1[%c0, %c0_0] : memref<1024x128xbf16, #tpu.memory_space<vmem>>, vector<1024x128xbf16>
    %c0_1 = arith.constant 0 : index
    %c0_2 = arith.constant 0 : index
    %1 = vector.load %arg2[%c0_1, %c0_2] : memref<128x128xbf16, #tpu.memory_space<vmem>>, vector<128x128xbf16>
    %cst = arith.constant dense<0.000000e+00> : vector<1024x128xf32>
    %2 = tpu.matmul %0, %1, %cst {dimension_numbers = #tpu.dot_dimension_numbers<[1], [0], [0], [1], [0, 0, 1, 1], [], []>} : vector<1024x128xbf16>, vector<128x128xbf16>, vector<1024x128xf32> -> vector<1024x128xf32>
    %3 = arith.truncf %2 : vector<1024x128xf32> to vector<1024x128xbf16>
    %c0_3 = arith.constant 0 : index
    %c0_4 = arith.constant 0 : index
    %4 = vector.load %arg3[%c0_3, %c0_4] : memref<1024x128xbf16, #tpu.memory_space<vmem>>, vector<1024x128xbf16>
    tpu.vector_store %arg3[%c0_3, %c0_4], %3 {strides = array<i32>} : memref<1024x128xbf16, #tpu.memory_space<vmem>>, vector<1024x128xbf16>,
    return
  }
  func.func @transform_0(%arg0: i32) -> (i32, i32) {
    %c0_i32 = arith.constant 0 : i32
    %c0_i32_0 = arith.constant 0 : i32
    return %arg0, %c0_i32 : i32, i32
  }
  func.func @transform_1(%arg0: i32) -> (i32, i32) {
    %c0_i32 = arith.constant 0 : i32
    %c0_i32_0 = arith.constant 0 : i32
    %c0_i32_1 = arith.constant 0 : i32
    return %c0_i32, %c0_i32_0 : i32, i32
  }
  func.func @transform_2(%arg0: i32) -> (i32, i32) {
    %c0_i32 = arith.constant 0 : i32
    %c0_i32_0 = arith.constant 0 : i32
    return %arg0, %c0_i32 : i32, i32
  }
}

</mosaic_0001>

<bundles_post_ra>
// kernel: tpu_custom_call.1
= control target key start
LH: loop header
LB: loop body
LE: loop exit
PB: predicated region body
PF: predicated region fallthrough
CT: control target
= control target key end

     0   :  { %7 = vsyncpa [#allocation3], 0  ;;  %s2977_s0 = inlined_call_operand.hbm [shape: bf16[1024,128], index: 0, kind: input, shape index: {}]   ;;  %s2978_s1 = inlined_call_operand.hbm [shape: bf16[128,128], index: 1, kind: input, shape index: {}]   ;;  %s2979_s2 = inlined_call_operand.hbm [shape: bf16[1024,128], index: 2, kind: output, shape index: {}]  }
   0x1   :  { %8 = vsyncpa [#allocation6], 0 }
   0x2   :  { %9 = vsyncpa [#allocation4], 0  ;;  %s2912_s9 = smov [#allocation2]   ;;  %s2840_s13 = scalar_lea.hbm %s2977_s0, 8192 }
   0x3   :  { %s15_s10 = sshll.u32 %s2912_s9, 4  ;;  %p2841_p0 = scmp.ne.s32.totalorder %s2977_s0, %s2840_s13  ;;  %s16_s10 = int_to_ptr.vmem [resolvable:$true] %s15_s10 }
   0x4   :  { %p2844_p1 = scmp.lt.u32.totalorder %s2840_s13, %s2977_s0 }
   0x6   :  { %p2846_p2 = pnand %p2844_p1, %p2841_p0 }
   0x8   :  { %2849 = shalt.err (!%p2846_p2)
}
   0x9   :  { %s2850_s18 = scalar_lea.vmem %s16_s10, 8192  ;;  %p2855_p4 = scmp.lt.s32.totalorder %s16_s10, %s16_s10 }
   0xa   :  { %p2851_p3 = scmp.ne.s32.totalorder %s16_s10, %s2850_s18  ;;  %p2856_p5 = scmp.lt.s32.totalorder %s2850_s18, %s2850_s18 }
   0xc   :  { %p2857_p6 = por %p2856_p5, %p2855_p4 }
   0xe   :  { %p2858_p7 = pnand %p2857_p6, %p2851_p3 }
  0x10   :  { %2861 = shalt.err (!%p2858_p7)
}
  0x11   :  { %s2913_s19 = smov 64   ;;  %s2914_s20 = smov 4  }
  0x12   :  { %21 = dma.hbm_to_vmem [thread:$0]  %s2977_s0, 8192, %s16_s10, [#allocation3], %s2913_s19, %s2913_s19, %s2914_s20  }
  0x13   :  { %s2915_s23 = smov [#allocation5]   ;;  %s2862_s27 = scalar_lea.hbm %s2978_s1, 1024 }
  0x14   :  { %s27_s24 = sshll.u32 %s2915_s23, 4  ;;  %p2863_p8 = scmp.ne.s32.totalorder %s2978_s1, %s2862_s27  ;;  %s28_s24 = int_to_ptr.vmem [resolvable:$true] %s27_s24 }
  0x15   :  { %p2866_p9 = scmp.lt.u32.totalorder %s2862_s27, %s2978_s1 }
  0x17   :  { %p2868_p10 = pnand %p2866_p9, %p2863_p8 }
  0x19   :  { %2871 = shalt.err (!%p2868_p10)
}
  0x1a   :  { %s2872_s4 = scalar_lea.vmem %s28_s24, 1024  ;;  %p2877_p12 = scmp.lt.s32.totalorder %s28_s24, %s28_s24 }
  0x1b   :  { %p2873_p11 = scmp.ne.s32.totalorder %s28_s24, %s2872_s4  ;;  %p2878_p13 = scmp.lt.s32.totalorder %s2872_s4, %s2872_s4 }
  0x1d   :  { %p2879_p0 = por %p2878_p13, %p2877_p12 }
  0x1f   :  { %p2880_p1 = pnand %p2879_p0, %p2873_p11 }
  0x21   :  { %2883 = shalt.err (!%p2880_p1)
}
  0x22   :  { %33 = dma.hbm_to_vmem [thread:$0]  %s2978_s1, 1024, %s28_s24, [#allocation6], %s2913_s19, %s2913_s19, %s2914_s20  }
  0x23   :  { %2906 = dma.done.wait [#allocation3], 8192  }
  0x24   :  { %2907 = vsyncadd [#allocation3], 4294959104 }
  0x25   :  { %2908 = dma.done.wait [#allocation6], 1024  }
  0x26   :  { %2909 = vsyncadd [#allocation6], 4294966272  ;;  %v2768_v0 = vld [vmem:[#allocation5] sm:$0xff]   ;;  %v2769_v1 = vld [vmem:[#allocation5 + $0x8] sm:$0xff]   ;;  %s2916_s1 = smov [#allocation7]  }
  0x27   :  { %2603 = vmatprep.subr.bf16.mxu0 %v2768_v0  ;;  %2747 = vmatprep.subr.bf16.mxu1 %v2768_v0  ;;  %v2770_v2 = vld [vmem:[#allocation5 + $0x10] sm:$0xff]   ;;  %v2771_v3 = vld [vmem:[#allocation5 + $0x18] sm:$0xff]   ;;  %v2776_v4 = vld [vmem:[#allocation2] sm:$0xff]   ;;  %s1807_s6 = sshll.u32 %s2916_s1, 4  ;;  %s1808_s6 = int_to_ptr.vmem [resolvable:$true] %s1807_s6 }
  0x28   :  { %2604 = vmatpush3.bf16.msra.mxu0 %v2768_v0  ;;  %2755 = vmatpush3.bf16.msra.mxu1 %v2768_v0  ;;  %v2777_v5 = vld [vmem:[#allocation2 + $0x100] sm:$0xff]   ;;  %v2773_v7 = vld [vmem:[#allocation5 + $0x28] sm:$0xff]   ;;  %v2774_v8 = vld [vmem:[#allocation5 + $0x30] sm:$0xff]   ;;  %s2884_s7 = scalar_lea.vmem %s1808_s6, 8192  ;;  %p2889_p3 = scmp.lt.s32.totalorder %s1808_s6, %s1808_s6 }
  0x29   :  { %2605 = vmatprep.subr.bf16.mxu0 %v2769_v1  ;;  %2748 = vmatprep.subr.bf16.mxu1 %v2769_v1  ;;  %v2772_v6 = vld [vmem:[#allocation5 + $0x20] sm:$0xff]   ;;  %v2775_v9 = vld [vmem:[#allocation5 + $0x38] sm:$0xff]   ;;  %v2778_v10 = vld [vmem:[#allocation2 + $0x8] sm:$0xff]   ;;  %p2885_p2 = scmp.ne.s32.totalorder %s1808_s6, %s2884_s7  ;;  %p2890_p4 = scmp.lt.s32.totalorder %s2884_s7, %s2884_s7 }
  0x2a   :  { %2619 = vmatprep.mubr.bf16.mxu0 %v2776_v4  ;;  %2683 = vmatprep.mubr.bf16.mxu1 %v2777_v5  ;;  %v2779_v11 = vld [vmem:[#allocation2 + $0x108] sm:$0xff]   ;;  %v2780_v12 = vld [vmem:[#allocation2 + $0x10] sm:$0xff]   ;;  %v2782_v14 = vld [vmem:[#allocation2 + $0x18] sm:$0xff]  }
  0x2b   :  { %v2781_v13 = vld [vmem:[#allocation2 + $0x110] sm:$0xff]   ;;  %v2783_v15 = vld [vmem:[#allocation2 + $0x118] sm:$0xff]   ;;  %v2784_v16 = vld [vmem:[#allocation2 + $0x20] sm:$0xff]   ;;  %p2891_p5 = por %p2890_p4, %p2889_p3 }
  0x2c   :  { %2606 = vmatpush3.bf16.msra.mxu0 %v2769_v1  ;;  %2756 = vmatpush3.bf16.msra.mxu1 %v2769_v1  ;;  %v2785_v17 = vld [vmem:[#allocation2 + $0x120] sm:$0xff]   ;;  %v2786_v18 = vld [vmem:[#allocation2 + $0x28] sm:$0xff]   ;;  %v2788_v20 = vld [vmem:[#allocation2 + $0x30] sm:$0xff]  }
  0x2d   :  { %2607 = vmatprep.subr.bf16.mxu0 %v2770_v2  ;;  %2749 = vmatprep.subr.bf16.mxu1 %v2770_v2  ;;  %v2787_v19 = vld [vmem:[#allocation2 + $0x128] sm:$0xff]   ;;  %v2789_v21 = vld [vmem:[#allocation2 + $0x130] sm:$0xff]   ;;  %v2790_v22 = vld [vmem:[#allocation2 + $0x38] sm:$0xff]   ;;  %p2892_p6 = pnand %p2891_p5, %p2885_p2 }
  0x2e   :  { %v2791_v23 = vld [vmem:[#allocation2 + $0x138] sm:$0xff]   ;;  %v2792_v24 = vld [vmem:[#allocation2 + $0x40] sm:$0xff]   ;;  %v2794_v26 = vld [vmem:[#allocation2 + $0x48] sm:$0xff]  }
  0x2f   :  { %v2793_v25 = vld [vmem:[#allocation2 + $0x140] sm:$0xff]   ;;  %v2795_v27 = vld [vmem:[#allocation2 + $0x148] sm:$0xff]   ;;  %v2796_v28 = vld [vmem:[#allocation2 + $0x50] sm:$0xff]  }
  0x30   :  { %2608 = vmatpush3.bf16.msra.mxu0 %v2770_v2  ;;  %2757 = vmatpush3.bf16.msra.mxu1 %v2770_v2  ;;  %v2797_v29 = vld [vmem:[#allocation2 + $0x150] sm:$0xff]   ;;  %v2798_v30 = vld [vmem:[#allocation2 + $0x58] sm:$0xff]   ;;  %v2800_v32 = vld [vmem:[#allocation2 + $0x60] sm:$0xff]  }
  0x31   :  { %2609 = vmatprep.subr.bf16.mxu0 %v2771_v3  ;;  %2750 = vmatprep.subr.bf16.mxu1 %v2771_v3  ;;  %v2799_v31 = vld [vmem:[#allocation2 + $0x158] sm:$0xff]   ;;  %v2801_v33 = vld [vmem:[#allocation2 + $0x160] sm:$0xff]   ;;  %v2802_v34 = vld [vmem:[#allocation2 + $0x68] sm:$0xff]  }
  0x32   :  { %v2803_v35 = vld [vmem:[#allocation2 + $0x168] sm:$0xff]   ;;  %v2804_v36 = vld [vmem:[#allocation2 + $0x70] sm:$0xff]   ;;  %v2806_v38 = vld [vmem:[#allocation2 + $0x78] sm:$0xff]  }
  0x33   :  { %v2805_v37 = vld [vmem:[#allocation2 + $0x170] sm:$0xff]   ;;  %v2807_v39 = vld [vmem:[#allocation2 + $0x178] sm:$0xff]   ;;  %v2808_v40 = vld [vmem:[#allocation2 + $0x80] sm:$0xff]  }
  0x34   :  { %2610 = vmatpush3.bf16.msra.mxu0 %v2771_v3  ;;  %2758 = vmatpush3.bf16.msra.mxu1 %v2771_v3  ;;  %v2809_v41 = vld [vmem:[#allocation2 + $0x180] sm:$0xff]   ;;  %v2810_v42 = vld [vmem:[#allocation2 + $0x88] sm:$0xff]   ;;  %v2812_v44 = vld [vmem:[#allocation2 + $0x90] sm:$0xff]  }
  0x35   :  { %2611 = vmatprep.subr.bf16.mxu0 %v2772_v6  ;;  %2751 = vmatprep.subr.bf16.mxu1 %v2772_v6  ;;  %v2811_v43 = vld [vmem:[#allocation2 + $0x188] sm:$0xff]   ;;  %v2813_v45 = vld [vmem:[#allocation2 + $0x190] sm:$0xff]   ;;  %v2814_v46 = vld [vmem:[#allocation2 + $0x98] sm:$0xff]  }
  0x36   :  { %v2815_v47 = vld [vmem:[#allocation2 + $0x198] sm:$0xff]   ;;  %v2816_v48 = vld [vmem:[#allocation2 + $0xa0] sm:$0xff]   ;;  %v2818_v50 = vld [vmem:[#allocation2 + $0xa8] sm:$0xff]  }
  0x37   :  { %v2817_v49 = vld [vmem:[#allocation2 + $0x1a0] sm:$0xff]   ;;  %v2819_v51 = vld [vmem:[#allocation2 + $0x1a8] sm:$0xff]   ;;  %v2820_v52 = vld [vmem:[#allocation2 + $0xb0] sm:$0xff]  }
  0x38   :  { %2612 = vmatpush3.bf16.msra.mxu0 %v2772_v6  ;;  %2759 = vmatpush3.bf16.msra.mxu1 %v2772_v6  ;;  %v2821_v53 = vld [vmem:[#allocation2 + $0x1b0] sm:$0xff]   ;;  %v2822_v54 = vld [vmem:[#allocation2 + $0xb8] sm:$0xff]   ;;  %v2824_v56 = vld [vmem:[#allocation2 + $0xc0] sm:$0xff]  }
  0x39   :  { %2613 = vmatprep.subr.bf16.mxu0 %v2773_v7  ;;  %2752 = vmatprep.subr.bf16.mxu1 %v2773_v7  ;;  %v2823_v55 = vld [vmem:[#allocation2 + $0x1b8] sm:$0xff]   ;;  %v2825_v57 = vld [vmem:[#allocation2 + $0x1c0] sm:$0xff]   ;;  %v2826_v58 = vld [vmem:[#allocation2 + $0xc8] sm:$0xff]  }
  0x3a   :  { %v2827_v59 = vld [vmem:[#allocation2 + $0x1c8] sm:$0xff]   ;;  %v2828_v60 = vld [vmem:[#allocation2 + $0xd0] sm:$0xff]   ;;  %v2830_v62 = vld [vmem:[#allocation2 + $0xd8] sm:$0xff]  }
  0x3b   :  { %v2829_v61 = vld [vmem:[#allocation2 + $0x1d0] sm:$0xff]   ;;  %v2831_v63 = vld [vmem:[#allocation2 + $0x1d8] sm:$0xff]   ;;  %v2832_v0 = vld [vmem:[#allocation2 + $0xe0] sm:$0xff]  }
  0x3c   :  { %2614 = vmatpush3.bf16.msra.mxu0 %v2773_v7  ;;  %2760 = vmatpush3.bf16.msra.mxu1 %v2773_v7  ;;  %v2833_v1 = vld [vmem:[#allocation2 + $0x1e0] sm:$0xff]   ;;  %v2834_v2 = vld [vmem:[#allocation2 + $0xe8] sm:$0xff]   ;;  %v2836_v4 = vld [vmem:[#allocation2 + $0xf0] sm:$0xff]  }
  0x3d   :  { %2615 = vmatprep.subr.bf16.mxu0 %v2774_v8  ;;  %2753 = vmatprep.subr.bf16.mxu1 %v2774_v8  ;;  %v2835_v3 = vld [vmem:[#allocation2 + $0x1e8] sm:$0xff]   ;;  %v2837_v5 = vld [vmem:[#allocation2 + $0x1f0] sm:$0xff]   ;;  %v2838_v6 = vld [vmem:[#allocation2 + $0xf8] sm:$0xff]  }
  0x3e   :  { %v2839_v7 = vld [vmem:[#allocation2 + $0x1f8] sm:$0xff]  }
  0x40   :  { %2616 = vmatpush3.bf16.msra.mxu0 %v2774_v8  ;;  %2761 = vmatpush3.bf16.msra.mxu1 %v2774_v8 }
  0x41   :  { %2617 = vmatprep.subr.bf16.mxu0 %v2775_v9  ;;  %2754 = vmatprep.subr.bf16.mxu1 %v2775_v9 }
  0x44   :  { %2618 = vmatpush3.bf16.msra.mxu0 %v2775_v9  ;;  %2762 = vmatpush3.bf16.msra.mxu1 %v2775_v9 }
  0x47   :  { %2620 = vmatmul.mubr.bf16.vlgmr.msra.gmra.mrb[0].mxu0 %v2778_v10  ;;  %2684 = vmatmul.mubr.bf16.vlgmr.msra.gmra.mrb[0].mxu1 %v2779_v11 }
  0x48   :  { %2623 = vmatprep.mubr.bf16.mxu0 %v2780_v12  ;;  %2687 = vmatprep.mubr.bf16.mxu1 %v2781_v13 }
  0x4f   :  { %2624 = vmatmul.mubr.bf16.gmra.mrb[4].mxu0 %v2782_v14  ;;  %2688 = vmatmul.mubr.bf16.gmra.mrb[4].mxu1 %v2783_v15 }
  0x50   :  { %2627 = vmatprep.mubr.bf16.mxu0 %v2784_v16  ;;  %2691 = vmatprep.mubr.bf16.mxu1 %v2785_v17 }
  0x57   :  { %2628 = vmatmul.mubr.bf16.gmra.mrb[8].mxu0 %v2786_v18  ;;  %2692 = vmatmul.mubr.bf16.gmra.mrb[8].mxu1 %v2787_v19 }
  0x58   :  { %2631 = vmatprep.mubr.bf16.mxu0 %v2788_v20  ;;  %2695 = vmatprep.mubr.bf16.mxu1 %v2789_v21 }
  0x5f   :  { %2632 = vmatmul.mubr.bf16.gmra.mrb[12].mxu0 %v2790_v22  ;;  %2696 = vmatmul.mubr.bf16.gmra.mrb[12].mxu1 %v2791_v23 }
  0x60   :  { %2635 = vmatprep.mubr.bf16.mxu0 %v2792_v24  ;;  %2699 = vmatprep.mubr.bf16.mxu1 %v2793_v25 }
  0x67   :  { %2636 = vmatmul.mubr.bf16.gmra.mrb[16].mxu0 %v2794_v26  ;;  %2700 = vmatmul.mubr.bf16.gmra.mrb[16].mxu1 %v2795_v27 }
  0x68   :  { %2639 = vmatprep.mubr.bf16.mxu0 %v2796_v28  ;;  %2703 = vmatprep.mubr.bf16.mxu1 %v2797_v29 }
  0x6f   :  { %2640 = vmatmul.mubr.bf16.gmra.mrb[20].mxu0 %v2798_v30  ;;  %2704 = vmatmul.mubr.bf16.gmra.mrb[20].mxu1 %v2799_v31 }
  0x70   :  { %2643 = vmatprep.mubr.bf16.mxu0 %v2800_v32  ;;  %2707 = vmatprep.mubr.bf16.mxu1 %v2801_v33 }
  0x77   :  { %2644 = vmatmul.mubr.bf16.gmra.mrb[24].mxu0 %v2802_v34  ;;  %2708 = vmatmul.mubr.bf16.gmra.mrb[24].mxu1 %v2803_v35 }
  0x78   :  { %2647 = vmatprep.mubr.bf16.mxu0 %v2804_v36  ;;  %2711 = vmatprep.mubr.bf16.mxu1 %v2805_v37 }
  0x7f   :  { %2648 = vmatmul.mubr.bf16.gmra.mrb[28].mxu0 %v2806_v38  ;;  %2712 = vmatmul.mubr.bf16.gmra.mrb[28].mxu1 %v2807_v39 }
  0x80   :  { %2651 = vmatprep.mubr.bf16.mxu0 %v2808_v40  ;;  %2715 = vmatprep.mubr.bf16.mxu1 %v2809_v41 }
  0x87   :  { %2652 = vmatmul.mubr.bf16.gmra.mrb[32].mxu0 %v2810_v42  ;;  %2716 = vmatmul.mubr.bf16.gmra.mrb[32].mxu1 %v2811_v43 }
  0x88   :  { %2655 = vmatprep.mubr.bf16.mxu0 %v2812_v44  ;;  %2719 = vmatprep.mubr.bf16.mxu1 %v2813_v45 }
  0x8f   :  { %2656 = vmatmul.mubr.bf16.gmra.mrb[36].mxu0 %v2814_v46  ;;  %2720 = vmatmul.mubr.bf16.gmra.mrb[36].mxu1 %v2815_v47 }
  0x90   :  { %2659 = vmatprep.mubr.bf16.mxu0 %v2816_v48  ;;  %2723 = vmatprep.mubr.bf16.mxu1 %v2817_v49 }
  0x97   :  { %2660 = vmatmul.mubr.bf16.gmra.mrb[40].mxu0 %v2818_v50  ;;  %2724 = vmatmul.mubr.bf16.gmra.mrb[40].mxu1 %v2819_v51 }
  0x98   :  { %2663 = vmatprep.mubr.bf16.mxu0 %v2820_v52  ;;  %2727 = vmatprep.mubr.bf16.mxu1 %v2821_v53 }
  0x9f   :  { %2664 = vmatmul.mubr.bf16.gmra.mrb[44].mxu0 %v2822_v54  ;;  %2728 = vmatmul.mubr.bf16.gmra.mrb[44].mxu1 %v2823_v55 }
  0xa0   :  { %2667 = vmatprep.mubr.bf16.mxu0 %v2824_v56  ;;  %2731 = vmatprep.mubr.bf16.mxu1 %v2825_v57 }
  0xa7   :  { %2668 = vmatmul.mubr.bf16.gmra.mrb[48].mxu0 %v2826_v58  ;;  %2732 = vmatmul.mubr.bf16.gmra.mrb[48].mxu1 %v2827_v59 }
  0xa8   :  { %2671 = vmatprep.mubr.bf16.mxu0 %v2828_v60  ;;  %2735 = vmatprep.mubr.bf16.mxu1 %v2829_v61 }
  0xaf   :  { %2672 = vmatmul.mubr.bf16.gmra.mrb[52].mxu0 %v2830_v62  ;;  %2736 = vmatmul.mubr.bf16.gmra.mrb[52].mxu1 %v2831_v63 }
  0xb0   :  { %2675 = vmatprep.mubr.bf16.mxu0 %v2832_v0  ;;  %2739 = vmatprep.mubr.bf16.mxu1 %v2833_v1 }
  0xb7   :  { %2676 = vmatmul.mubr.bf16.gmra.mrb[56].mxu0 %v2834_v2  ;;  %2740 = vmatmul.mubr.bf16.gmra.mrb[56].mxu1 %v2835_v3 }
  0xb8   :  { %2679 = vmatprep.mubr.bf16.mxu0 %v2836_v4  ;;  %2743 = vmatprep.mubr.bf16.mxu1 %v2837_v5 }
  0xbf   :  { %2680 = vmatmul.mubr.bf16.gmra.mrb[60].mxu0 %v2838_v6  ;;  %2744 = vmatmul.mubr.bf16.gmra.mrb[60].mxu1 %v2839_v7 }
 0x11a   :  { %v2621_v8 = vpop.f32.mrb[0].mxu0  ;;  %v2685_v9 = vpop.f32.mrb[0].mxu1 }
 0x11b   :  { %v651_v10 = vpop.f32.mrb[1].mxu0  ;;  %v907_v11 = vpop.f32.mrb[1].mxu1 }
 0x11c   :  { %v2622_v12 = vpop.f32.mrb[2].mxu0  ;;  %v2686_v13 = vpop.f32.mrb[2].mxu1 }
 0x11d   :  { %v2156_v14 = vpack.c.bf16 %v2622_v12, %v2621_v8  ;;  %v2316_v15 = vpack.c.bf16 %v2686_v13, %v2685_v9  ;;  %v654_v16 = vpop.f32.mrb[3].mxu0  ;;  %v910_v17 = vpop.f32.mrb[3].mxu1 }
 0x11e   :  { %v2151_v18 = vpack.c.bf16 %v654_v16, %v651_v10  ;;  %v2311_v19 = vpack.c.bf16 %v910_v17, %v907_v11 }
 0x11f   :  { %2468 = vst [vmem:[#allocation7 + $0x8] sm:$0xff] %v2156_v14   ;;  %2500 = vst [vmem:[#allocation7 + $0x108] sm:$0xff] %v2316_v15  }
 0x120   :  { %2152 = vst [vmem:[#allocation7] sm:$0xff] %v2151_v18   ;;  %2499 = vst [vmem:[#allocation7 + $0x100] sm:$0xff] %v2311_v19  }
 0x122   :  { %v2625_v20 = vpop.f32.mrb[4].mxu0  ;;  %v2689_v21 = vpop.f32.mrb[4].mxu1 }
 0x123   :  { %v667_v22 = vpop.f32.mrb[5].mxu0  ;;  %v923_v23 = vpop.f32.mrb[5].mxu1 }
 0x124   :  { %v2626_v24 = vpop.f32.mrb[6].mxu0  ;;  %v2690_v25 = vpop.f32.mrb[6].mxu1 }
 0x125   :  { %v2166_v26 = vpack.c.bf16 %v2626_v24, %v2625_v20  ;;  %v2326_v27 = vpack.c.bf16 %v2690_v25, %v2689_v21  ;;  %v670_v28 = vpop.f32.mrb[7].mxu0  ;;  %v926_v29 = vpop.f32.mrb[7].mxu1 }
 0x126   :  { %v2161_v30 = vpack.c.bf16 %v670_v28, %v667_v22  ;;  %v2321_v31 = vpack.c.bf16 %v926_v29, %v923_v23 }
 0x127   :  { %2470 = vst [vmem:[#allocation7 + $0x18] sm:$0xff] %v2166_v26   ;;  %2502 = vst [vmem:[#allocation7 + $0x118] sm:$0xff] %v2326_v27  }
 0x128   :  { %2469 = vst [vmem:[#allocation7 + $0x10] sm:$0xff] %v2161_v30   ;;  %2501 = vst [vmem:[#allocation7 + $0x110] sm:$0xff] %v2321_v31  }
 0x12a   :  { %v2629_v32 = vpop.f32.mrb[8].mxu0  ;;  %v2693_v33 = vpop.f32.mrb[8].mxu1 }
 0x12b   :  { %v683_v34 = vpop.f32.mrb[9].mxu0  ;;  %v939_v35 = vpop.f32.mrb[9].mxu1 }
 0x12c   :  { %v2630_v36 = vpop.f32.mrb[10].mxu0  ;;  %v2694_v37 = vpop.f32.mrb[10].mxu1 }
 0x12d   :  { %v2176_v38 = vpack.c.bf16 %v2630_v36, %v2629_v32  ;;  %v2336_v39 = vpack.c.bf16 %v2694_v37, %v2693_v33  ;;  %v686_v40 = vpop.f32.mrb[11].mxu0  ;;  %v942_v41 = vpop.f32.mrb[11].mxu1 }
 0x12e   :  { %v2171_v42 = vpack.c.bf16 %v686_v40, %v683_v34  ;;  %v2331_v43 = vpack.c.bf16 %v942_v41, %v939_v35 }
 0x12f   :  { %2472 = vst [vmem:[#allocation7 + $0x28] sm:$0xff] %v2176_v38   ;;  %2504 = vst [vmem:[#allocation7 + $0x128] sm:$0xff] %v2336_v39  }
 0x130   :  { %2471 = vst [vmem:[#allocation7 + $0x20] sm:$0xff] %v2171_v42   ;;  %2503 = vst [vmem:[#allocation7 + $0x120] sm:$0xff] %v2331_v43  }
 0x132   :  { %v2633_v44 = vpop.f32.mrb[12].mxu0  ;;  %v2697_v45 = vpop.f32.mrb[12].mxu1 }
 0x133   :  { %v699_v46 = vpop.f32.mrb[13].mxu0  ;;  %v955_v47 = vpop.f32.mrb[13].mxu1 }
 0x134   :  { %v2634_v48 = vpop.f32.mrb[14].mxu0  ;;  %v2698_v49 = vpop.f32.mrb[14].mxu1 }
 0x135   :  { %v2186_v50 = vpack.c.bf16 %v2634_v48, %v2633_v44  ;;  %v2346_v51 = vpack.c.bf16 %v2698_v49, %v2697_v45  ;;  %v702_v52 = vpop.f32.mrb[15].mxu0  ;;  %v958_v53 = vpop.f32.mrb[15].mxu1 }
 0x136   :  { %v2181_v54 = vpack.c.bf16 %v702_v52, %v699_v46  ;;  %v2341_v55 = vpack.c.bf16 %v958_v53, %v955_v47 }
 0x137   :  { %2474 = vst [vmem:[#allocation7 + $0x38] sm:$0xff] %v2186_v50   ;;  %2506 = vst [vmem:[#allocation7 + $0x138] sm:$0xff] %v2346_v51  }
 0x138   :  { %2473 = vst [vmem:[#allocation7 + $0x30] sm:$0xff] %v2181_v54   ;;  %2505 = vst [vmem:[#allocation7 + $0x130] sm:$0xff] %v2341_v55  }
 0x13a   :  { %v2637_v56 = vpop.f32.mrb[16].mxu0  ;;  %v2701_v57 = vpop.f32.mrb[16].mxu1 }
 0x13b   :  { %v715_v58 = vpop.f32.mrb[17].mxu0  ;;  %v971_v59 = vpop.f32.mrb[17].mxu1 }
 0x13c   :  { %v2638_v60 = vpop.f32.mrb[18].mxu0  ;;  %v2702_v61 = vpop.f32.mrb[18].mxu1 }
 0x13d   :  { %v2196_v62 = vpack.c.bf16 %v2638_v60, %v2637_v56  ;;  %v2356_v63 = vpack.c.bf16 %v2702_v61, %v2701_v57  ;;  %v718_v0 = vpop.f32.mrb[19].mxu0  ;;  %v974_v1 = vpop.f32.mrb[19].mxu1 }
 0x13e   :  { %v2191_v2 = vpack.c.bf16 %v718_v0, %v715_v58  ;;  %v2351_v3 = vpack.c.bf16 %v974_v1, %v971_v59 }
 0x13f   :  { %2476 = vst [vmem:[#allocation7 + $0x48] sm:$0xff] %v2196_v62   ;;  %2508 = vst [vmem:[#allocation7 + $0x148] sm:$0xff] %v2356_v63  }
 0x140   :  { %2475 = vst [vmem:[#allocation7 + $0x40] sm:$0xff] %v2191_v2   ;;  %2507 = vst [vmem:[#allocation7 + $0x140] sm:$0xff] %v2351_v3  }
 0x142   :  { %v2641_v4 = vpop.f32.mrb[20].mxu0  ;;  %v2705_v5 = vpop.f32.mrb[20].mxu1 }
 0x143   :  { %v731_v6 = vpop.f32.mrb[21].mxu0  ;;  %v987_v7 = vpop.f32.mrb[21].mxu1 }
 0x144   :  { %v2642_v8 = vpop.f32.mrb[22].mxu0  ;;  %v2706_v9 = vpop.f32.mrb[22].mxu1 }
 0x145   :  { %v2206_v10 = vpack.c.bf16 %v2642_v8, %v2641_v4  ;;  %v2366_v11 = vpack.c.bf16 %v2706_v9, %v2705_v5  ;;  %v734_v12 = vpop.f32.mrb[23].mxu0  ;;  %v990_v13 = vpop.f32.mrb[23].mxu1 }
 0x146   :  { %v2201_v14 = vpack.c.bf16 %v734_v12, %v731_v6  ;;  %v2361_v15 = vpack.c.bf16 %v990_v13, %v987_v7 }
 0x147   :  { %2478 = vst [vmem:[#allocation7 + $0x58] sm:$0xff] %v2206_v10   ;;  %2510 = vst [vmem:[#allocation7 + $0x158] sm:$0xff] %v2366_v11  }
 0x148   :  { %2477 = vst [vmem:[#allocation7 + $0x50] sm:$0xff] %v2201_v14   ;;  %2509 = vst [vmem:[#allocation7 + $0x150] sm:$0xff] %v2361_v15  }
 0x14a   :  { %v2645_v16 = vpop.f32.mrb[24].mxu0  ;;  %v2709_v17 = vpop.f32.mrb[24].mxu1 }
 0x14b   :  { %v747_v18 = vpop.f32.mrb[25].mxu0  ;;  %v1003_v19 = vpop.f32.mrb[25].mxu1 }
 0x14c   :  { %v2646_v20 = vpop.f32.mrb[26].mxu0  ;;  %v2710_v21 = vpop.f32.mrb[26].mxu1 }
 0x14d   :  { %v2216_v22 = vpack.c.bf16 %v2646_v20, %v2645_v16  ;;  %v2376_v23 = vpack.c.bf16 %v2710_v21, %v2709_v17  ;;  %v750_v24 = vpop.f32.mrb[27].mxu0  ;;  %v1006_v25 = vpop.f32.mrb[27].mxu1 }
 0x14e   :  { %v2211_v26 = vpack.c.bf16 %v750_v24, %v747_v18  ;;  %v2371_v27 = vpack.c.bf16 %v1006_v25, %v1003_v19 }
 0x14f   :  { %2480 = vst [vmem:[#allocation7 + $0x68] sm:$0xff] %v2216_v22   ;;  %2512 = vst [vmem:[#allocation7 + $0x168] sm:$0xff] %v2376_v23  }
 0x150   :  { %2479 = vst [vmem:[#allocation7 + $0x60] sm:$0xff] %v2211_v26   ;;  %2511 = vst [vmem:[#allocation7 + $0x160] sm:$0xff] %v2371_v27  }
 0x152   :  { %v2649_v28 = vpop.f32.mrb[28].mxu0  ;;  %v2713_v29 = vpop.f32.mrb[28].mxu1 }
 0x153   :  { %v763_v30 = vpop.f32.mrb[29].mxu0  ;;  %v1019_v31 = vpop.f32.mrb[29].mxu1 }
 0x154   :  { %v2650_v32 = vpop.f32.mrb[30].mxu0  ;;  %v2714_v33 = vpop.f32.mrb[30].mxu1 }
 0x155   :  { %v2226_v34 = vpack.c.bf16 %v2650_v32, %v2649_v28  ;;  %v2386_v35 = vpack.c.bf16 %v2714_v33, %v2713_v29  ;;  %v766_v36 = vpop.f32.mrb[31].mxu0  ;;  %v1022_v37 = vpop.f32.mrb[31].mxu1 }
 0x156   :  { %v2221_v38 = vpack.c.bf16 %v766_v36, %v763_v30  ;;  %v2381_v39 = vpack.c.bf16 %v1022_v37, %v1019_v31 }
 0x157   :  { %2482 = vst [vmem:[#allocation7 + $0x78] sm:$0xff] %v2226_v34   ;;  %2514 = vst [vmem:[#allocation7 + $0x178] sm:$0xff] %v2386_v35  }
 0x158   :  { %2481 = vst [vmem:[#allocation7 + $0x70] sm:$0xff] %v2221_v38   ;;  %2513 = vst [vmem:[#allocation7 + $0x170] sm:$0xff] %v2381_v39  }
 0x15a   :  { %v2653_v40 = vpop.f32.mrb[32].mxu0  ;;  %v2717_v41 = vpop.f32.mrb[32].mxu1 }
 0x15b   :  { %v779_v42 = vpop.f32.mrb[33].mxu0  ;;  %v1035_v43 = vpop.f32.mrb[33].mxu1 }
 0x15c   :  { %v2654_v44 = vpop.f32.mrb[34].mxu0  ;;  %v2718_v45 = vpop.f32.mrb[34].mxu1 }
 0x15d   :  { %v2236_v46 = vpack.c.bf16 %v2654_v44, %v2653_v40  ;;  %v2396_v47 = vpack.c.bf16 %v2718_v45, %v2717_v41  ;;  %v782_v48 = vpop.f32.mrb[35].mxu0  ;;  %v1038_v49 = vpop.f32.mrb[35].mxu1 }
 0x15e   :  { %v2231_v50 = vpack.c.bf16 %v782_v48, %v779_v42  ;;  %v2391_v51 = vpack.c.bf16 %v1038_v49, %v1035_v43 }
 0x15f   :  { %2484 = vst [vmem:[#allocation7 + $0x88] sm:$0xff] %v2236_v46   ;;  %2516 = vst [vmem:[#allocation7 + $0x188] sm:$0xff] %v2396_v47  }
 0x160   :  { %2483 = vst [vmem:[#allocation7 + $0x80] sm:$0xff] %v2231_v50   ;;  %2515 = vst [vmem:[#allocation7 + $0x180] sm:$0xff] %v2391_v51  }
 0x162   :  { %v2657_v52 = vpop.f32.mrb[36].mxu0  ;;  %v2721_v53 = vpop.f32.mrb[36].mxu1 }
 0x163   :  { %v795_v54 = vpop.f32.mrb[37].mxu0  ;;  %v1051_v55 = vpop.f32.mrb[37].mxu1 }
 0x164   :  { %v2658_v56 = vpop.f32.mrb[38].mxu0  ;;  %v2722_v57 = vpop.f32.mrb[38].mxu1 }
 0x165   :  { %v2246_v58 = vpack.c.bf16 %v2658_v56, %v2657_v52  ;;  %v2406_v59 = vpack.c.bf16 %v2722_v57, %v2721_v53  ;;  %v798_v60 = vpop.f32.mrb[39].mxu0  ;;  %v1054_v61 = vpop.f32.mrb[39].mxu1 }
 0x166   :  { %v2241_v62 = vpack.c.bf16 %v798_v60, %v795_v54  ;;  %v2401_v63 = vpack.c.bf16 %v1054_v61, %v1051_v55 }
 0x167   :  { %2486 = vst [vmem:[#allocation7 + $0x98] sm:$0xff] %v2246_v58   ;;  %2518 = vst [vmem:[#allocation7 + $0x198] sm:$0xff] %v2406_v59  }
 0x168   :  { %2485 = vst [vmem:[#allocation7 + $0x90] sm:$0xff] %v2241_v62   ;;  %2517 = vst [vmem:[#allocation7 + $0x190] sm:$0xff] %v2401_v63  }
 0x16a   :  { %v2661_v0 = vpop.f32.mrb[40].mxu0  ;;  %v2725_v1 = vpop.f32.mrb[40].mxu1 }
 0x16b   :  { %v811_v2 = vpop.f32.mrb[41].mxu0  ;;  %v1067_v3 = vpop.f32.mrb[41].mxu1 }
 0x16c   :  { %v2662_v4 = vpop.f32.mrb[42].mxu0  ;;  %v2726_v5 = vpop.f32.mrb[42].mxu1 }
 0x16d   :  { %v2256_v6 = vpack.c.bf16 %v2662_v4, %v2661_v0  ;;  %v2416_v7 = vpack.c.bf16 %v2726_v5, %v2725_v1  ;;  %v814_v8 = vpop.f32.mrb[43].mxu0  ;;  %v1070_v9 = vpop.f32.mrb[43].mxu1 }
 0x16e   :  { %v2251_v10 = vpack.c.bf16 %v814_v8, %v811_v2  ;;  %v2411_v11 = vpack.c.bf16 %v1070_v9, %v1067_v3 }
 0x16f   :  { %2488 = vst [vmem:[#allocation7 + $0xa8] sm:$0xff] %v2256_v6   ;;  %2520 = vst [vmem:[#allocation7 + $0x1a8] sm:$0xff] %v2416_v7  }
 0x170   :  { %2487 = vst [vmem:[#allocation7 + $0xa0] sm:$0xff] %v2251_v10   ;;  %2519 = vst [vmem:[#allocation7 + $0x1a0] sm:$0xff] %v2411_v11  }
 0x172   :  { %v2665_v12 = vpop.f32.mrb[44].mxu0  ;;  %v2729_v13 = vpop.f32.mrb[44].mxu1 }
 0x173   :  { %v827_v14 = vpop.f32.mrb[45].mxu0  ;;  %v1083_v15 = vpop.f32.mrb[45].mxu1 }
 0x174   :  { %v2666_v16 = vpop.f32.mrb[46].mxu0  ;;  %v2730_v17 = vpop.f32.mrb[46].mxu1 }
 0x175   :  { %v2266_v18 = vpack.c.bf16 %v2666_v16, %v2665_v12  ;;  %v2426_v19 = vpack.c.bf16 %v2730_v17, %v2729_v13  ;;  %v830_v20 = vpop.f32.mrb[47].mxu0  ;;  %v1086_v21 = vpop.f32.mrb[47].mxu1 }
 0x176   :  { %v2261_v22 = vpack.c.bf16 %v830_v20, %v827_v14  ;;  %v2421_v23 = vpack.c.bf16 %v1086_v21, %v1083_v15 }
 0x177   :  { %2490 = vst [vmem:[#allocation7 + $0xb8] sm:$0xff] %v2266_v18   ;;  %2522 = vst [vmem:[#allocation7 + $0x1b8] sm:$0xff] %v2426_v19  }
 0x178   :  { %2489 = vst [vmem:[#allocation7 + $0xb0] sm:$0xff] %v2261_v22   ;;  %2521 = vst [vmem:[#allocation7 + $0x1b0] sm:$0xff] %v2421_v23  }
 0x17a   :  { %v2669_v24 = vpop.f32.mrb[48].mxu0  ;;  %v2733_v25 = vpop.f32.mrb[48].mxu1 }
 0x17b   :  { %v843_v26 = vpop.f32.mrb[49].mxu0  ;;  %v1099_v27 = vpop.f32.mrb[49].mxu1 }
 0x17c   :  { %v2670_v28 = vpop.f32.mrb[50].mxu0  ;;  %v2734_v29 = vpop.f32.mrb[50].mxu1 }
 0x17d   :  { %v2276_v30 = vpack.c.bf16 %v2670_v28, %v2669_v24  ;;  %v2436_v31 = vpack.c.bf16 %v2734_v29, %v2733_v25  ;;  %v846_v32 = vpop.f32.mrb[51].mxu0  ;;  %v1102_v33 = vpop.f32.mrb[51].mxu1 }
 0x17e   :  { %v2271_v34 = vpack.c.bf16 %v846_v32, %v843_v26  ;;  %v2431_v35 = vpack.c.bf16 %v1102_v33, %v1099_v27 }
 0x17f   :  { %2492 = vst [vmem:[#allocation7 + $0xc8] sm:$0xff] %v2276_v30   ;;  %2524 = vst [vmem:[#allocation7 + $0x1c8] sm:$0xff] %v2436_v31  }
 0x180   :  { %2491 = vst [vmem:[#allocation7 + $0xc0] sm:$0xff] %v2271_v34   ;;  %2523 = vst [vmem:[#allocation7 + $0x1c0] sm:$0xff] %v2431_v35  }
 0x182   :  { %v2673_v36 = vpop.f32.mrb[52].mxu0  ;;  %v2737_v37 = vpop.f32.mrb[52].mxu1 }
 0x183   :  { %v859_v38 = vpop.f32.mrb[53].mxu0  ;;  %v1115_v39 = vpop.f32.mrb[53].mxu1 }
 0x184   :  { %v2674_v40 = vpop.f32.mrb[54].mxu0  ;;  %v2738_v41 = vpop.f32.mrb[54].mxu1 }
 0x185   :  { %v2286_v42 = vpack.c.bf16 %v2674_v40, %v2673_v36  ;;  %v2446_v43 = vpack.c.bf16 %v2738_v41, %v2737_v37  ;;  %v862_v44 = vpop.f32.mrb[55].mxu0  ;;  %v1118_v45 = vpop.f32.mrb[55].mxu1 }
 0x186   :  { %v2281_v46 = vpack.c.bf16 %v862_v44, %v859_v38  ;;  %v2441_v47 = vpack.c.bf16 %v1118_v45, %v1115_v39 }
 0x187   :  { %2494 = vst [vmem:[#allocation7 + $0xd8] sm:$0xff] %v2286_v42   ;;  %2526 = vst [vmem:[#allocation7 + $0x1d8] sm:$0xff] %v2446_v43  }
 0x188   :  { %2493 = vst [vmem:[#allocation7 + $0xd0] sm:$0xff] %v2281_v46   ;;  %2525 = vst [vmem:[#allocation7 + $0x1d0] sm:$0xff] %v2441_v47  }
 0x18a   :  { %v2677_v48 = vpop.f32.mrb[56].mxu0  ;;  %v2741_v49 = vpop.f32.mrb[56].mxu1 }
 0x18b   :  { %v875_v50 = vpop.f32.mrb[57].mxu0  ;;  %v1131_v51 = vpop.f32.mrb[57].mxu1 }
 0x18c   :  { %v2678_v52 = vpop.f32.mrb[58].mxu0  ;;  %v2742_v53 = vpop.f32.mrb[58].mxu1 }
 0x18d   :  { %v2296_v54 = vpack.c.bf16 %v2678_v52, %v2677_v48  ;;  %v2456_v55 = vpack.c.bf16 %v2742_v53, %v2741_v49  ;;  %v878_v56 = vpop.f32.mrb[59].mxu0  ;;  %v1134_v57 = vpop.f32.mrb[59].mxu1 }
 0x18e   :  { %v2291_v58 = vpack.c.bf16 %v878_v56, %v875_v50  ;;  %v2451_v59 = vpack.c.bf16 %v1134_v57, %v1131_v51 }
 0x18f   :  { %2496 = vst [vmem:[#allocation7 + $0xe8] sm:$0xff] %v2296_v54   ;;  %2528 = vst [vmem:[#allocation7 + $0x1e8] sm:$0xff] %v2456_v55  }
 0x190   :  { %2495 = vst [vmem:[#allocation7 + $0xe0] sm:$0xff] %v2291_v58   ;;  %2527 = vst [vmem:[#allocation7 + $0x1e0] sm:$0xff] %v2451_v59  }
 0x192   :  { %v2681_v60 = vpop.f32.mrb[60].mxu0  ;;  %v2745_v61 = vpop.f32.mrb[60].mxu1 }
 0x193   :  { %v891_v62 = vpop.f32.mrb[61].mxu0  ;;  %v1147_v63 = vpop.f32.mrb[61].mxu1 }
 0x194   :  { %v2682_v0 = vpop.f32.mrb[62].mxu0  ;;  %v2746_v1 = vpop.f32.mrb[62].mxu1 }
 0x195   :  { %v2306_v2 = vpack.c.bf16 %v2682_v0, %v2681_v60  ;;  %v2466_v3 = vpack.c.bf16 %v2746_v1, %v2745_v61  ;;  %v894_v4 = vpop.f32.mrb[63].mxu0  ;;  %v1150_v5 = vpop.f32.mrb[63].mxu1 }
 0x196   :  { %v2301_v6 = vpack.c.bf16 %v894_v4, %v891_v62  ;;  %v2461_v7 = vpack.c.bf16 %v1150_v5, %v1147_v63 }
 0x197   :  { %2498 = vst [vmem:[#allocation7 + $0xf8] sm:$0xff] %v2306_v2   ;;  %2530 = vst [vmem:[#allocation7 + $0x1f8] sm:$0xff] %v2466_v3  }
 0x198   :  { %2497 = vst [vmem:[#allocation7 + $0xf0] sm:$0xff] %v2301_v6   ;;  %2529 = vst [vmem:[#allocation7 + $0x1f0] sm:$0xff] %v2461_v7  }
 0x199   :  { %2895 = shalt.err (!%p2892_p6)
}
 0x19a   :  { %s2896_s10 = scalar_lea.hbm %s2979_s2, 8192 }
 0x19b   :  { %p2897_p7 = scmp.ne.s32.totalorder %s2979_s2, %s2896_s10  ;;  %p2900_p8 = scmp.lt.u32.totalorder %s2896_s10, %s2979_s2 }
 0x19d   :  { %p2902_p9 = pnand %p2900_p8, %p2897_p7 }
 0x19f   :  { %2905 = shalt.err (!%p2902_p9)
}
 0x1a0   :  { %1813 = dma.vmem_to_hbm [thread:$0]  %s1808_s6, 8192, %s2979_s2, [#allocation4], %s2913_s19, %s2913_s19, %s2914_s20  }
 0x1a1   :  { %2910 = dma.done.wait [#allocation4], 8192  }
 0x1a2   :  { %2911 = vsyncadd [#allocation4], 4294959104 }
 0x1a3   :  { %1817 = vsyncpa [#allocation3], 1 }
 0x1a4   :  { %1818 = vsyncpa [#allocation6], 1 }
 0x1a5   :  { %1819 = vsyncpa [#allocation4], 1 }

</bundles_post_ra>
